<compile_context>
chip_gen: v6e
topology: v6e:2x2x1
jax: 0.10.0
libtpu: 0.0.40
codegen_flags: <defaults>
</compile_context>

<pallas_src>
import jax
import jax.numpy as jnp
from jax import lax
from jax.experimental import pallas as pl
from jax.experimental.pallas import tpu as pltpu

_CONTRACT_LAST = (((1,), (1,)), ((), ()))  # a @ b.T without materializing b.T

# Padded feature / contraction width shared by every packed row.
_P = 16


def _fused_kernel(x1_ref, slab_ref, o_ref):
    # x1_ref : (M, 16)   -- K padded 12 -> 16 with zeros
    # slab_ref: (35, 16) -- rows  0:16  x2 padded (F, K) -> (16, 16)
    #                       rows 16:32  W  padded (N, F) -> (16, 16)
    #                       row  32     bias, row 33 gamma, row 34 beta
    x1 = x1_ref[...]
    slab = slab_ref[...]

    x2 = slab[0:_P, :]            # (16, 16)
    w = slab[_P:2 * _P, :]        # (16, 16)
    bias = slab[2 * _P:2 * _P + 1, :]      # (1, 16)
    gamma = slab[2 * _P + 1:2 * _P + 2, :]  # (1, 16)
    beta = slab[2 * _P + 2:2 * _P + 3, :]   # (1, 16)

    # v1 = x1 @ x2.T : (M, 16) x (16, 16) -> (M, 16); padded rows of x2 are
    # zero, so v1[:, 12:] == 0 and padded K columns contribute nothing.
    v1 = lax.dot_general(
        x1, x2,
        dimension_numbers=_CONTRACT_LAST,
        preferred_element_type=jnp.float32,
    )

    # Dropout(p=0.2) in eval semantics == identity.
    # TODO(synk): training-mode stochastic dropout (pltpu.prng_seed +
    # pltpu.prng_random_bits + 1/(1-p) scaling) intentionally not wired in.
    x3 = v1

    # Linear(12, 16): x3 @ W.T + b; padded F columns of W are zero.
    v2 = lax.dot_general(
        x3, w,
        dimension_numbers=_CONTRACT_LAST,
        preferred_element_type=jnp.float32,
    ) + bias

    # LayerNorm(16), eps=1e-5, population variance (PyTorch semantics),
    # two-pass variance reusing the centered temporary.
    mean = jnp.mean(v2, axis=-1, keepdims=True)
    centered = v2 - mean
    var = jnp.mean(centered * centered, axis=-1, keepdims=True)
    normed = centered * lax.rsqrt(var + 1e-5)
    o_ref[...] = normed * gamma + beta


def pack_operands(x1, x2, w, b, gamma, beta):
    """Host-side packing: K/F-pad everything to 16 lanes, one weight slab."""
    M, K = x1.shape          # (2, 12)
    F = x2.shape[0]          # 12
    N = w.shape[0]           # 16

    x1_pad = jnp.zeros((M, _P), jnp.float32).at[:, :K].set(x1)
    x2_pad = jnp.zeros((_P, _P), jnp.float32).at[:F, :K].set(x2)
    w_pad = jnp.zeros((N, _P), jnp.float32).at[:, :F].set(w)
    params = jnp.stack([b, gamma, beta], axis=0)                 # (3, 16)
    slab = jnp.concatenate([x2_pad, w_pad, params], axis=0)      # (35, 16)
    return x1_pad, slab


def model_forward(x1_pad, slab):
    M = x1_pad.shape[0]
    N = _P
    vmem = pl.BlockSpec(memory_space=pltpu.MemorySpace.VMEM)
    flops = 2 * M * _P * _P * 2 + 8 * M * N                      # 2 matmuls + LN
    bytes_accessed = (x1_pad.size + slab.size + M * N) * 4
    return pl.pallas_call(
        _fused_kernel,
        out_shape=jax.ShapeDtypeStruct((M, N), jnp.float32),
        in_specs=[vmem, vmem],
        out_specs=vmem,
        cost_estimate=pl.CostEstimate(
            flops=flops, transcendentals=0, bytes_accessed=bytes_accessed),
    )(x1_pad, slab)


if __name__ == "__main__":
    key = jax.random.PRNGKey(0)
    k1, k2, k3, k4 = jax.random.split(key, 4)

    # x1:(M,K), x2:(F,K) so x2.T:(K,F); Linear(F=12 -> N=16).
    M, K, F, N = 2, 12, 12, 16

    x1 = jax.random.normal(k1, (M, K), dtype=jnp.float32)
    x2 = jax.random.normal(k2, (F, K), dtype=jnp.float32)

    # Deterministic parameter init (nn.Linear-style uniform bound = 1/sqrt(fan_in)).
    bound = 1.0 / jnp.sqrt(jnp.float32(F))
    w = jax.random.uniform(k3, (N, F), minval=-bound, maxval=bound, dtype=jnp.float32)
    b = jax.random.uniform(k4, (N,), minval=-bound, maxval=bound, dtype=jnp.float32)
    gamma = jnp.ones((N,), dtype=jnp.float32)   # LayerNorm weight init
    beta = jnp.zeros((N,), dtype=jnp.float32)   # LayerNorm bias init

    x1_pad, slab = pack_operands(x1, x2, w, b, gamma, beta)
    out = model_forward(x1_pad, slab)
    jax.block_until_ready(out)

    # Sanity check against a pure-JAX reference on the ORIGINAL (unpadded) data.
    v1 = x1 @ x2.T
    v2 = v1 @ w.T + b
    mean = jnp.mean(v2, axis=-1, keepdims=True)
    var = jnp.mean((v2 - mean) ** 2, axis=-1, keepdims=True)
    ref = (v2 - mean) / jnp.sqrt(var + 1e-5) * gamma + beta
    assert out.shape == (M, N)
    assert jnp.max(jnp.abs(out - ref)) < 1e-4

    print("KERNEL_OK")
</pallas_src>

<mosaic_0001>
module attributes {stable_mosaic.version = 11 : i64} {
  func.func @_fused_kernel(%arg0: memref<2x16xf32, #tpu.memory_space<vmem>>, %arg1: memref<35x16xf32, #tpu.memory_space<vmem>>, %arg2: memref<2x16xf32, #tpu.memory_space<vmem>>) attributes {dimension_semantics = [], scalar_prefetch = 0 : i64, scratch_operands = 0 : i64, tpu.core_type = #tpu.core_type<tc>} {
    %c0 = arith.constant 0 : index
    %c0_0 = arith.constant 0 : index
    %0 = vector.load %arg0[%c0, %c0_0] : memref<2x16xf32, #tpu.memory_space<vmem>>, vector<2x16xf32>
    %c0_1 = arith.constant 0 : index
    %c0_2 = arith.constant 0 : index
    %1 = vector.load %arg1[%c0_1, %c0_2] : memref<35x16xf32, #tpu.memory_space<vmem>>, vector<35x16xf32>
    %2 = vector.extract_strided_slice %1 {offsets = [0, 0], sizes = [16, 16], strides = [1, 1]} : vector<35x16xf32> to vector<16x16xf32>
    %3 = vector.extract_strided_slice %1 {offsets = [16, 0], sizes = [16, 16], strides = [1, 1]} : vector<35x16xf32> to vector<16x16xf32>
    %4 = vector.extract_strided_slice %1 {offsets = [32, 0], sizes = [1, 16], strides = [1, 1]} : vector<35x16xf32> to vector<1x16xf32>
    %5 = vector.extract_strided_slice %1 {offsets = [33, 0], sizes = [1, 16], strides = [1, 1]} : vector<35x16xf32> to vector<1x16xf32>
    %6 = vector.extract_strided_slice %1 {offsets = [34, 0], sizes = [1, 16], strides = [1, 1]} : vector<35x16xf32> to vector<1x16xf32>
    %cst = arith.constant dense<0.000000e+00> : vector<2x16xf32>
    %7 = tpu.matmul %0, %2, %cst {dimension_numbers = #tpu.dot_dimension_numbers<[1], [1], [0], [0], [0, 0, 1, 0], [], []>} : vector<2x16xf32>, vector<16x16xf32>, vector<2x16xf32> -> vector<2x16xf32>
    %cst_3 = arith.constant dense<0.000000e+00> : vector<2x16xf32>
    %8 = tpu.matmul %7, %3, %cst_3 {dimension_numbers = #tpu.dot_dimension_numbers<[1], [1], [0], [0], [0, 0, 1, 0], [], []>} : vector<2x16xf32>, vector<16x16xf32>, vector<2x16xf32> -> vector<2x16xf32>
    %9 = vector.broadcast %4 : vector<1x16xf32> to vector<2x16xf32>
    %10 = arith.addf %8, %9 : vector<2x16xf32>
    %cst_4 = arith.constant dense<0.000000e+00> : vector<2xf32>
    %11 = vector.multi_reduction <add>, %10, %cst_4 [1] : vector<2x16xf32> to vector<2xf32>
    %12 = vector.shape_cast %11 : vector<2xf32> to vector<2x1xf32>
    %cst_5 = arith.constant 1.600000e+01 : f32
    %13 = vector.broadcast %cst_5 : f32 to vector<2x1xf32>
    %14 = arith.divf %12, %13 : vector<2x1xf32>
    %15 = vector.broadcast %14 : vector<2x1xf32> to vector<2x16xf32>
    %16 = arith.subf %10, %15 : vector<2x16xf32>
    %17 = arith.mulf %16, %16 : vector<2x16xf32>
    %cst_6 = arith.constant dense<0.000000e+00> : vector<2xf32>
    %18 = vector.multi_reduction <add>, %17, %cst_6 [1] : vector<2x16xf32> to vector<2xf32>
    %19 = vector.shape_cast %18 : vector<2xf32> to vector<2x1xf32>
    %cst_7 = arith.constant 1.600000e+01 : f32
    %20 = vector.broadcast %cst_7 : f32 to vector<2x1xf32>
    %21 = arith.divf %19, %20 : vector<2x1xf32>
    %cst_8 = arith.constant 9.99999974E-6 : f32
    %22 = vector.broadcast %cst_8 : f32 to vector<2x1xf32>
    %23 = arith.addf %21, %22 : vector<2x1xf32>
    %24 = math.rsqrt %23 : vector<2x1xf32>
    %25 = vector.broadcast %24 : vector<2x1xf32> to vector<2x16xf32>
    %26 = arith.mulf %16, %25 : vector<2x16xf32>
    %27 = vector.broadcast %5 : vector<1x16xf32> to vector<2x16xf32>
    %28 = arith.mulf %26, %27 : vector<2x16xf32>
    %29 = vector.broadcast %6 : vector<1x16xf32> to vector<2x16xf32>
    %30 = arith.addf %28, %29 : vector<2x16xf32>
    %c0_9 = arith.constant 0 : index
    %c0_10 = arith.constant 0 : index
    %31 = vector.load %arg2[%c0_9, %c0_10] : memref<2x16xf32, #tpu.memory_space<vmem>>, vector<2x16xf32>
    tpu.vector_store %arg2[%c0_9, %c0_10], %30 {strides = array<i32>} : memref<2x16xf32, #tpu.memory_space<vmem>>, vector<2x16xf32>,
    return
  }
}

</mosaic_0001>

<bundles_post_ra>
// kernel: tpu_custom_call.1
= control target key start
LH: loop header
LB: loop body
LE: loop exit
PB: predicated region body
PF: predicated region fallthrough
CT: control target
= control target key end

     0   :  { %vm18_vm0 = vcmask 130048   ;;  %v274_v2 = vmov 0.0   ;;  %vm275_vm1 = vmmov 0   ;;  %s322_s0 = inlined_call_operand.vmem [shape: f32[2,16], index: 0, kind: input, shape index: {}]   ;;  %s323_s1 = inlined_call_operand.vmem [shape: f32[35,16], index: 1, kind: input, shape index: {}]   ;;  %s324_s2 = inlined_call_operand.hbm [shape: f32[2,16], index: 2, kind: output, shape index: {}]  }
   0x1   :  { %v14_v0 = vld [vmem:[%s323_s1 + $0x8] sm:$0xff]  ;;  %v16_v1 = vld [vmem:[%s323_s1 + $0x18] sm:$0xff]  ;;  %233 = vmatprep.subr.mxu0 %v274_v2  ;;  %237 = vmatprep.mubr.msk.f32.mxu0 %vm275_vm1, %v274_v2 }
   0x2   :  { %7 = vsyncpa [#allocation3], 0  ;;  %234 = vmatpush3.xpose.msk.msra.mxu0 %vm18_vm0, %v14_v0  ;;  %240 = vmatprep.subr.mxu1 %v274_v2  ;;  %v13_v3 = vld [vmem:[%s323_s1] sm:$0xff]  ;;  %v15_v4 = vld [vmem:[%s323_s1 + $0x10] sm:$0xff]  ;;  %v98_v8 = vlaneseq  ;;  %vm181_vm2 = vcmask 123904  }
   0x3   :  { %235 = vmatprep.subr.mxu0 %v274_v2  ;;  %241 = vmatpush3.xpose.msk.msra.mxu1 %vm18_vm0, %v16_v1  ;;  %v12_v5 = vld [vmem:[%s322_s0] sm:$0x3]  ;;  %s276_s0 = smov [#allocation2]  }
   0x4   :  { %242 = vmatprep.subr.mxu1 %v274_v2  ;;  %244 = vmatprep.mubr.msk.f32.mxu1 %vm275_vm1, %v274_v2  ;;  %v99_v9 = vshrl.u32 %v98_v8, 7  ;;  %v17_v11 = vld [vmem:[%s323_s1 + $0x20] sm:$0x7]  ;;  %s213_s1 = sshll.u32 %s276_s0, 4  ;;  %s214_s1 = int_to_ptr.vmem [resolvable:$true] %s213_s1 }
   0x5   :  { %s252_s21 = scalar_lea.vmem %s214_s1, 32  ;;  %p257_p1 = scmp.lt.s32.totalorder %s214_s1, %s214_s1 }
   0x6   :  { %236 = vmatpush3.xpose.msk.msra.mxu0 %vm18_vm0, %v13_v3  ;;  %v100_v10 = vsub.s32 0, %v99_v9  ;;  %v198_v25 = vsub.s32 1, %v99_v9  ;;  %v203_v26 = vsub.s32 2, %v99_v9  ;;  %p253_p0 = scmp.ne.s32.totalorder %s214_s1, %s252_s21  ;;  %p258_p2 = scmp.lt.s32.totalorder %s252_s21, %s252_s21 }
   0x7   :  { %243 = vmatpush3.xpose.msk.msra.mxu1 %vm18_vm0, %v15_v4 }
   0x8   :  { %v101_v12 = vrot.slane %v17_v11, %v100_v10  ;;  %v199_v27 = vrot.slane %v17_v11, %v198_v25  ;;  %v204_v30 = vrot.slane %v17_v11, %v203_v26  ;;  %p259_p3 = por %p258_p2, %p257_p1 }
   0x9   :  { %238 = vmatmul.mubr.msk.f32.vlgmr.msra.gmra.mxu0 %vm18_vm0, %v12_v5 }
   0xa   :  { %p260_p4 = pnand %p259_p3, %p253_p0 }
  0xc9   :  { %v94_v6 = vpop.f32.mrf.mxu0 }
  0xca   :  { %245 = vmatmul.mubr.msk.f32.vlgmr.msra.gmra.mxu1 %vm18_vm0, %v94_v6 }
  0xcb   :  { %v239_v7 = vpop.f32.mrf.mxu0 }
 0x18a   :  { %v177_v13 = vpop.f32.mrf.mxu1 }
 0x18b   :  { %v178_v14 = vadd.f32 %v177_v13, %v101_v12 }
 0x18c   :  { %v246_v15 = vpop.f32.mrf.mxu1 }
 0x18d   :  { %v182_v16 = vsel %vm181_vm2, %v178_v14, 0.0 }
 0x18e   :  { %183 = vadd.xlane.f32.xlu0 %v182_v16 }
 0x217   :  { %v184_v17 = vpop.xlane.xlu0 %183 }
 0x218   :  { %v186_v18 = vmul.f32 0.0625, %v184_v17 }
 0x21a   :  { %v187_v19 = vsub.f32 %v178_v14, %v186_v18 }
 0x21c   :  { %v188_v20 = vmul.f32 %v187_v19, %v187_v19 }
 0x21e   :  { %v189_v21 = vsel %vm181_vm2, %v188_v20, 0.0 }
 0x21f   :  { %190 = vadd.xlane.f32.xlu0 %v189_v21 }
 0x2a8   :  { %v191_v22 = vpop.xlane.xlu0 %190 }
 0x2a9   :  { %v192_v23 = vmul.f32 0.0625, %v191_v22 }
 0x2ab   :  { %v193_v24 = vadd.f32 1e-05, %v192_v23 }
 0x2ad   :  { %250 = vrsqrt.f32 %v193_v24 }
 0x2ba   :  { %v251_v28 = vpop.eup %250 }
 0x2bb   :  { %v195_v29 = vmul.f32 %v251_v28, %v187_v19 }
 0x2bd   :  { %v200_v31 = vmul.f32 %v199_v27, %v195_v29 }
 0x2bf   :  { %v205_v32 = vadd.f32 %v204_v30, %v200_v31 }
 0x2c1   :  { %206 = vst.msk [vmem:[#allocation2] sm:$0x3] %vm181_vm2, %v205_v32 }
 0x2c2   :  { %263 = shalt.err (!%p260_p4)
}
 0x2c3   :  { %216 = dma.vmem_to_hbm [thread:$0]  %s214_s1, 32, %s324_s2, [#allocation3]  }
 0x2c4   :  { %272 = dma.done.wait [#allocation3], 32  }
 0x2c5   :  { %273 = vsyncadd [#allocation3], 4294967264 }
 0x2c6   :  { %220 = vsyncpa [#allocation3], 1 }

</bundles_post_ra>
